<compile_context>
chip_gen: v5e
topology: v5e:2x2
jax: 0.10.0
libtpu: 0.0.40
codegen_flags: <defaults>
</compile_context>

<pallas_src>
import functools
import math

import jax
import jax.numpy as jnp
from jax.experimental import pallas as pl
from jax.experimental.pallas import tpu as pltpu


def _transformer_layer_kernel(x_ref, wq_ref, wk_ref, wv_ref, b_in_ref,
                              wout3_ref, bout_ref, wfc1_ref, wfc2_ref,
                              o_ref, *, num_heads: int):
    f32 = jnp.float32
    cdt = wq_ref.dtype                      # MXU input dtype (bf16 by default)

    x = x_ref[0]                            # (L, C) fp32, one batch element
    L, C = x.shape
    H = num_heads
    Dh = C // H
    scale = 1.0 / math.sqrt(Dh)

    x_c = x.astype(cdt)

    # --- fused (external q/k/v Linear ∘ MHA in_proj): 3 big (L,C)x(C,C) GEMMs ---
    # Weights are already composed + transposed on the host: y = x @ W + b.
    q = jnp.dot(x_c, wq_ref[...], preferred_element_type=f32) + b_in_ref[0:1, :]
    k = jnp.dot(x_c, wk_ref[...], preferred_element_type=f32) + b_in_ref[1:2, :]
    v = jnp.dot(x_c, wv_ref[...], preferred_element_type=f32) + b_in_ref[2:3, :]

    # --- heads as a leading batch dim: (H, L, Dh) ---
    def split_heads(t):
        return jnp.stack([t[:, h * Dh:(h + 1) * Dh] for h in range(H)], axis=0)

    q3 = split_heads(q * scale).astype(cdt)
    k3 = split_heads(k).astype(cdt)
    v3 = split_heads(v).astype(cdt)

    # --- batched scaled-dot-product attention (softmax math in fp32) ---
    s = jnp.einsum("hld,hmd->hlm", q3, k3, preferred_element_type=f32)
    s = s - jnp.max(s, axis=-1, keepdims=True)
    p = jnp.exp(s)
    p = p * pl.reciprocal(jnp.sum(p, axis=-1, keepdims=True), approx=True)
    o3 = jnp.einsum("hlm,hmd->hld", p.astype(cdt), v3,
                    preferred_element_type=f32)

    # --- out_proj applied per head, then summed over heads ---
    # (== concat(heads) @ W_out.T, but avoids a heads->lanes concatenate)
    attn = jnp.einsum("hld,hdc->hlc", o3.astype(cdt), wout3_ref[...],
                      preferred_element_type=f32)
    attn = jnp.sum(attn, axis=0) + bout_ref[...]
    x1 = attn + x                            # residual in fp32

    # --- feed-forward: fc2(fc1(x1)) + x1 (no activation in the reference) ---
    h1 = jnp.dot(x1.astype(cdt), wfc1_ref[...], preferred_element_type=f32)
    h2 = jnp.dot(h1.astype(cdt), wfc2_ref[...], preferred_element_type=f32)
    o_ref[0] = (x1 + h2).astype(o_ref.dtype)


def transformer_layer(x, params, num_heads, compute_dtype=jnp.bfloat16):
    """x: (L, N, C) seq-first (nn.MultiheadAttention default) -> (L, N, C)."""
    L, N, C = x.shape
    H = num_heads
    Dh = C // H
    f32 = jnp.float32
    wq, wk, wv, win, bin_, wout, bout, wfc1, wfc2 = params

    # Host-side, one-time weight prep:
    #   * fold external q/k/v Linears into in_proj (associativity),
    #   * pre-transpose everything so the kernel does plain x @ W,
    #   * split out_proj per head so the kernel sums over heads instead of
    #     concatenating along lanes,
    #   * cast MXU operands to bf16 (halves weight VMEM; fp32 accumulation).
    wq_eff_t = (win[:C] @ wq).T.astype(compute_dtype)          # (C, C)
    wk_eff_t = (win[C:2 * C] @ wk).T.astype(compute_dtype)     # (C, C)
    wv_eff_t = (win[2 * C:] @ wv).T.astype(compute_dtype)      # (C, C)
    b_in = bin_.reshape(3, C).astype(f32)                      # rows: q, k, v bias
    wout3 = wout.T.reshape(H, Dh, C).astype(compute_dtype)     # per-head out_proj
    bout2d = bout.reshape(1, C).astype(f32)
    wfc1_t = wfc1.T.astype(compute_dtype)
    wfc2_t = wfc2.T.astype(compute_dtype)

    xb = jnp.transpose(x, (1, 0, 2))                           # (N, L, C)

    full = lambda shape: pl.BlockSpec(shape, lambda b: (0,) * len(shape))

    out = pl.pallas_call(
        functools.partial(_transformer_layer_kernel, num_heads=num_heads),
        out_shape=jax.ShapeDtypeStruct((N, L, C), x.dtype),
        grid_spec=pltpu.PrefetchScalarGridSpec(
            num_scalar_prefetch=0,
            grid=(N,),
            in_specs=[
                pl.BlockSpec((1, L, C), lambda b: (b, 0, 0)),  # x, per batch elem
                full((C, C)),          # fused q weight (pre-transposed)
                full((C, C)),          # fused k weight
                full((C, C)),          # fused v weight
                full((3, C)),          # in_proj bias rows (q, k, v)
                full((H, Dh, C)),      # out_proj weight, split per head
                full((1, C)),          # out_proj bias
                full((C, C)),          # fc1 (pre-transposed)
                full((C, C)),          # fc2 (pre-transposed)
            ],
            out_specs=pl.BlockSpec((1, L, C), lambda b: (b, 0, 0)),
        ),
        compiler_params=pltpu.CompilerParams(
            dimension_semantics=("parallel",),
            vmem_limit_bytes=64 * 1024 * 1024,
        ),
    )(xb, wq_eff_t, wk_eff_t, wv_eff_t, b_in, wout3, bout2d, wfc1_t, wfc2_t)

    return jnp.transpose(out, (1, 0, 2))


def transformer_layer_ref(x, params, num_heads):
    """Pure-JAX fp32 reference mirroring PyTorch nn.MultiheadAttention semantics."""
    L, N, C = x.shape
    wq, wk, wv, win, bin_, wout, bout, wfc1, wfc2 = params
    Dh = C // num_heads

    q0 = x @ wq.T
    k0 = x @ wk.T
    v0 = x @ wv.T
    q = q0 @ win[:C].T + bin_[:C]
    k = k0 @ win[C:2 * C].T + bin_[C:2 * C]
    v = v0 @ win[2 * C:].T + bin_[2 * C:]

    def split(t):  # (L, N, C) -> (N, H, L, Dh)
        return jnp.transpose(t.reshape(L, N, num_heads, Dh), (1, 2, 0, 3))

    qh, kh, vh = split(q), split(k), split(v)
    s = jnp.einsum("nhld,nhmd->nhlm", qh, kh) / math.sqrt(Dh)
    p = jax.nn.softmax(s, axis=-1)
    o = jnp.einsum("nhlm,nhmd->nhld", p, vh)            # (N, H, L, Dh)
    o = jnp.transpose(o, (2, 0, 1, 3)).reshape(L, N, C)
    attn = o @ wout.T + bout
    x1 = attn + x
    return x1 @ wfc1.T @ wfc2.T + x1


def make_params(key, C):
    ks = jax.random.split(key, 9)
    s = 0.1
    wq = s * jax.random.normal(ks[0], (C, C), jnp.float32)
    wk = s * jax.random.normal(ks[1], (C, C), jnp.float32)
    wv = s * jax.random.normal(ks[2], (C, C), jnp.float32)
    win = s * jax.random.normal(ks[3], (3 * C, C), jnp.float32)
    bin_ = s * jax.random.normal(ks[4], (3 * C,), jnp.float32)
    wout = s * jax.random.normal(ks[5], (C, C), jnp.float32)
    bout = s * jax.random.normal(ks[6], (C,), jnp.float32)
    wfc1 = s * jax.random.normal(ks[7], (C, C), jnp.float32)
    wfc2 = s * jax.random.normal(ks[8], (C, C), jnp.float32)
    return (wq, wk, wv, win, bin_, wout, bout, wfc1, wfc2)


if __name__ == "__main__":
    L, N, C, num_heads = 8, 2, 32, 4   # seq, batch, embed, heads

    key = jax.random.PRNGKey(0)
    kx, kp = jax.random.split(key)
    x = jax.random.normal(kx, (L, N, C), jnp.float32)
    params = make_params(kp, C)

    out = jax.block_until_ready(transformer_layer(x, params, num_heads))
    ref = transformer_layer_ref(x, params, num_heads)

    assert out.shape == (L, N, C)
    # bf16 MXU inputs (fp32 accumulation) + approx reciprocal -> loosened
    # tolerance vs. the pure-fp32 reference.
    assert jnp.allclose(out, ref, rtol=5e-2, atol=5e-2), "mismatch vs reference"

    print("KERNEL_OK")
</pallas_src>

<mosaic_0001>
module attributes {stable_mosaic.version = 11 : i64} {
  func.func @_transformer_layer_kernel(%arg0: i32, %arg1: memref<1x8x32xf32, #tpu.memory_space<vmem>>, %arg2: memref<32x32xbf16, #tpu.memory_space<vmem>>, %arg3: memref<32x32xbf16, #tpu.memory_space<vmem>>, %arg4: memref<32x32xbf16, #tpu.memory_space<vmem>>, %arg5: memref<3x32xf32, #tpu.memory_space<vmem>>, %arg6: memref<4x8x32xbf16, #tpu.memory_space<vmem>>, %arg7: memref<1x32xf32, #tpu.memory_space<vmem>>, %arg8: memref<32x32xbf16, #tpu.memory_space<vmem>>, %arg9: memref<32x32xbf16, #tpu.memory_space<vmem>>, %arg10: memref<1x8x32xf32, #tpu.memory_space<vmem>>) attributes {dimension_semantics = [#tpu.dimension_semantics<parallel>], iteration_bounds = array<i64: 2>, scalar_prefetch = 0 : i64, scratch_operands = 0 : i64, tpu.core_type = #tpu.core_type<tc>, window_params = [{transform_indices = @transform_0, window_bounds = array<i64: 1, 8, 32>}, {pipeline_mode = #tpu.pipeline_mode<synchronous>, transform_indices = @transform_1, window_bounds = array<i64: 32, 32>}, {pipeline_mode = #tpu.pipeline_mode<synchronous>, transform_indices = @transform_2, window_bounds = array<i64: 32, 32>}, {pipeline_mode = #tpu.pipeline_mode<synchronous>, transform_indices = @transform_3, window_bounds = array<i64: 32, 32>}, {pipeline_mode = #tpu.pipeline_mode<synchronous>, transform_indices = @transform_4, window_bounds = array<i64: 3, 32>}, {pipeline_mode = #tpu.pipeline_mode<synchronous>, transform_indices = @transform_5, window_bounds = array<i64: 4, 8, 32>}, {pipeline_mode = #tpu.pipeline_mode<synchronous>, transform_indices = @transform_6, window_bounds = array<i64: 1, 32>}, {pipeline_mode = #tpu.pipeline_mode<synchronous>, transform_indices = @transform_7, window_bounds = array<i64: 32, 32>}, {pipeline_mode = #tpu.pipeline_mode<synchronous>, transform_indices = @transform_8, window_bounds = array<i64: 32, 32>}, {transform_indices = @transform_9, window_bounds = array<i64: 1, 8, 32>}]} {
    %c0 = arith.constant 0 : index
    %c0_0 = arith.constant 0 : index
    %c0_1 = arith.constant 0 : index
    %0 = vector.load %arg1[%c0, %c0_0, %c0_1] : memref<1x8x32xf32, #tpu.memory_space<vmem>>, vector<1x8x32xf32>
    %1 = vector.shape_cast %0 : vector<1x8x32xf32> to vector<8x32xf32>
    %2 = arith.truncf %1 : vector<8x32xf32> to vector<8x32xbf16>
    %c0_2 = arith.constant 0 : index
    %c0_3 = arith.constant 0 : index
    %3 = vector.load %arg2[%c0_2, %c0_3] : memref<32x32xbf16, #tpu.memory_space<vmem>>, vector<32x32xbf16>
    %cst = arith.constant dense<0.000000e+00> : vector<8x32xf32>
    %4 = tpu.matmul %2, %3, %cst {dimension_numbers = #tpu.dot_dimension_numbers<[1], [0], [0], [1], [0, 0, 1, 1], [], []>} : vector<8x32xbf16>, vector<32x32xbf16>, vector<8x32xf32> -> vector<8x32xf32>
    %c0_4 = arith.constant 0 : index
    %c0_5 = arith.constant 0 : index
    %5 = vector.load %arg5[%c0_4, %c0_5] : memref<3x32xf32, #tpu.memory_space<vmem>>, vector<1x32xf32>
    %6 = vector.broadcast %5 : vector<1x32xf32> to vector<8x32xf32>
    %7 = arith.addf %4, %6 : vector<8x32xf32>
    %c0_6 = arith.constant 0 : index
    %c0_7 = arith.constant 0 : index
    %8 = vector.load %arg3[%c0_6, %c0_7] : memref<32x32xbf16, #tpu.memory_space<vmem>>, vector<32x32xbf16>
    %cst_8 = arith.constant dense<0.000000e+00> : vector<8x32xf32>
    %9 = tpu.matmul %2, %8, %cst_8 {dimension_numbers = #tpu.dot_dimension_numbers<[1], [0], [0], [1], [0, 0, 1, 1], [], []>} : vector<8x32xbf16>, vector<32x32xbf16>, vector<8x32xf32> -> vector<8x32xf32>
    %c1 = arith.constant 1 : index
    %c0_9 = arith.constant 0 : index
    %10 = vector.load %arg5[%c1, %c0_9] : memref<3x32xf32, #tpu.memory_space<vmem>>, vector<1x32xf32>
    %11 = vector.broadcast %10 : vector<1x32xf32> to vector<8x32xf32>
    %12 = arith.addf %9, %11 : vector<8x32xf32>
    %c0_10 = arith.constant 0 : index
    %c0_11 = arith.constant 0 : index
    %13 = vector.load %arg4[%c0_10, %c0_11] : memref<32x32xbf16, #tpu.memory_space<vmem>>, vector<32x32xbf16>
    %cst_12 = arith.constant dense<0.000000e+00> : vector<8x32xf32>
    %14 = tpu.matmul %2, %13, %cst_12 {dimension_numbers = #tpu.dot_dimension_numbers<[1], [0], [0], [1], [0, 0, 1, 1], [], []>} : vector<8x32xbf16>, vector<32x32xbf16>, vector<8x32xf32> -> vector<8x32xf32>
    %c2 = arith.constant 2 : index
    %c0_13 = arith.constant 0 : index
    %15 = vector.load %arg5[%c2, %c0_13] : memref<3x32xf32, #tpu.memory_space<vmem>>, vector<1x32xf32>
    %16 = vector.broadcast %15 : vector<1x32xf32> to vector<8x32xf32>
    %17 = arith.addf %14, %16 : vector<8x32xf32>
    %cst_14 = arith.constant 0.353553385 : f32
    %18 = vector.broadcast %cst_14 : f32 to vector<8x32xf32>
    %19 = arith.mulf %7, %18 : vector<8x32xf32>
    %20 = vector.extract_strided_slice %19 {offsets = [0, 0], sizes = [8, 8], strides = [1, 1]} : vector<8x32xf32> to vector<8x8xf32>
    %21 = vector.extract_strided_slice %19 {offsets = [0, 8], sizes = [8, 8], strides = [1, 1]} : vector<8x32xf32> to vector<8x8xf32>
    %22 = vector.extract_strided_slice %19 {offsets = [0, 16], sizes = [8, 8], strides = [1, 1]} : vector<8x32xf32> to vector<8x8xf32>
    %23 = vector.extract_strided_slice %19 {offsets = [0, 24], sizes = [8, 8], strides = [1, 1]} : vector<8x32xf32> to vector<8x8xf32>
    %24 = vector.shape_cast %20 : vector<8x8xf32> to vector<1x8x8xf32>
    %25 = vector.shape_cast %21 : vector<8x8xf32> to vector<1x8x8xf32>
    %26 = vector.shape_cast %22 : vector<8x8xf32> to vector<1x8x8xf32>
    %27 = vector.shape_cast %23 : vector<8x8xf32> to vector<1x8x8xf32>
    %28 = tpu.concatenate %24, %25, %26, %27 in 0 : vector<1x8x8xf32>, vector<1x8x8xf32>, vector<1x8x8xf32>, vector<1x8x8xf32> -> vector<4x8x8xf32>
    %29 = arith.truncf %28 : vector<4x8x8xf32> to vector<4x8x8xbf16>
    %30 = vector.extract_strided_slice %12 {offsets = [0, 0], sizes = [8, 8], strides = [1, 1]} : vector<8x32xf32> to vector<8x8xf32>
    %31 = vector.extract_strided_slice %12 {offsets = [0, 8], sizes = [8, 8], strides = [1, 1]} : vector<8x32xf32> to vector<8x8xf32>
    %32 = vector.extract_strided_slice %12 {offsets = [0, 16], sizes = [8, 8], strides = [1, 1]} : vector<8x32xf32> to vector<8x8xf32>
    %33 = vector.extract_strided_slice %12 {offsets = [0, 24], sizes = [8, 8], strides = [1, 1]} : vector<8x32xf32> to vector<8x8xf32>
    %34 = vector.shape_cast %30 : vector<8x8xf32> to vector<1x8x8xf32>
    %35 = vector.shape_cast %31 : vector<8x8xf32> to vector<1x8x8xf32>
    %36 = vector.shape_cast %32 : vector<8x8xf32> to vector<1x8x8xf32>
    %37 = vector.shape_cast %33 : vector<8x8xf32> to vector<1x8x8xf32>
    %38 = tpu.concatenate %34, %35, %36, %37 in 0 : vector<1x8x8xf32>, vector<1x8x8xf32>, vector<1x8x8xf32>, vector<1x8x8xf32> -> vector<4x8x8xf32>
    %39 = arith.truncf %38 : vector<4x8x8xf32> to vector<4x8x8xbf16>
    %40 = vector.extract_strided_slice %17 {offsets = [0, 0], sizes = [8, 8], strides = [1, 1]} : vector<8x32xf32> to vector<8x8xf32>
    %41 = vector.extract_strided_slice %17 {offsets = [0, 8], sizes = [8, 8], strides = [1, 1]} : vector<8x32xf32> to vector<8x8xf32>
    %42 = vector.extract_strided_slice %17 {offsets = [0, 16], sizes = [8, 8], strides = [1, 1]} : vector<8x32xf32> to vector<8x8xf32>
    %43 = vector.extract_strided_slice %17 {offsets = [0, 24], sizes = [8, 8], strides = [1, 1]} : vector<8x32xf32> to vector<8x8xf32>
    %44 = vector.shape_cast %40 : vector<8x8xf32> to vector<1x8x8xf32>
    %45 = vector.shape_cast %41 : vector<8x8xf32> to vector<1x8x8xf32>
    %46 = vector.shape_cast %42 : vector<8x8xf32> to vector<1x8x8xf32>
    %47 = vector.shape_cast %43 : vector<8x8xf32> to vector<1x8x8xf32>
    %48 = tpu.concatenate %44, %45, %46, %47 in 0 : vector<1x8x8xf32>, vector<1x8x8xf32>, vector<1x8x8xf32>, vector<1x8x8xf32> -> vector<4x8x8xf32>
    %49 = arith.truncf %48 : vector<4x8x8xf32> to vector<4x8x8xbf16>
    "tpu.trace_start"() <{level = 10 : i32, message = "hld,hmd->hlm"}> : () -> ()
    %cst_15 = arith.constant dense<0.000000e+00> : vector<4x8x8xf32>
    %50 = tpu.matmul %29, %39, %cst_15 {dimension_numbers = #tpu.dot_dimension_numbers<[2], [2], [1], [1], [0, 0, 0, 1, 1, 1], [0], [0]>} : vector<4x8x8xbf16>, vector<4x8x8xbf16>, vector<4x8x8xf32> -> vector<4x8x8xf32>
    "tpu.trace_stop"() : () -> ()
    %cst_16 = arith.constant dense<0xFF800000> : vector<4x8xf32>
    %51 = vector.multi_reduction <maximumf>, %50, %cst_16 [2] : vector<4x8x8xf32> to vector<4x8xf32>
    %52 = vector.shape_cast %51 : vector<4x8xf32> to vector<4x8x1xf32>
    %53 = vector.broadcast %52 : vector<4x8x1xf32> to vector<4x8x8xf32>
    %54 = arith.subf %50, %53 : vector<4x8x8xf32>
    %55 = math.exp %54 : vector<4x8x8xf32>
    %cst_17 = arith.constant dense<0.000000e+00> : vector<4x8xf32>
    %56 = vector.multi_reduction <add>, %55, %cst_17 [2] : vector<4x8x8xf32> to vector<4x8xf32>
    %57 = vector.shape_cast %56 : vector<4x8xf32> to vector<4x8x1xf32>
    %58 = tpu.reciprocal %57 {approx = true} : vector<4x8x1xf32> -> vector<4x8x1xf32>
    %59 = vector.broadcast %58 : vector<4x8x1xf32> to vector<4x8x8xf32>
    %60 = arith.mulf %55, %59 : vector<4x8x8xf32>
    %61 = arith.truncf %60 : vector<4x8x8xf32> to vector<4x8x8xbf16>
    "tpu.trace_start"() <{level = 10 : i32, message = "hlm,hmd->hld"}> : () -> ()
    %cst_18 = arith.constant dense<0.000000e+00> : vector<4x8x8xf32>
    %62 = tpu.matmul %61, %49, %cst_18 {dimension_numbers = #tpu.dot_dimension_numbers<[2], [1], [1], [2], [0, 0, 0, 1, 1, 2], [0], [0]>} : vector<4x8x8xbf16>, vector<4x8x8xbf16>, vector<4x8x8xf32> -> vector<4x8x8xf32>
    "tpu.trace_stop"() : () -> ()
    %63 = arith.truncf %62 : vector<4x8x8xf32> to vector<4x8x8xbf16>
    %c0_19 = arith.constant 0 : index
    %c0_20 = arith.constant 0 : index
    %c0_21 = arith.constant 0 : index
    %64 = vector.load %arg6[%c0_19, %c0_20, %c0_21] : memref<4x8x32xbf16, #tpu.memory_space<vmem>>, vector<4x8x32xbf16>
    "tpu.trace_start"() <{level = 10 : i32, message = "hld,hdc->hlc"}> : () -> ()
    %cst_22 = arith.constant dense<0.000000e+00> : vector<4x8x32xf32>
    %65 = tpu.matmul %63, %64, %cst_22 {dimension_numbers = #tpu.dot_dimension_numbers<[2], [1], [1], [2], [0, 0, 0, 1, 1, 2], [0], [0]>} : vector<4x8x8xbf16>, vector<4x8x32xbf16>, vector<4x8x32xf32> -> vector<4x8x32xf32>
    "tpu.trace_stop"() : () -> ()
    %cst_23 = arith.constant dense<0.000000e+00> : vector<8x32xf32>
    %66 = vector.multi_reduction <add>, %65, %cst_23 [0] : vector<4x8x32xf32> to vector<8x32xf32>
    %c0_24 = arith.constant 0 : index
    %c0_25 = arith.constant 0 : index
    %67 = vector.load %arg7[%c0_24, %c0_25] : memref<1x32xf32, #tpu.memory_space<vmem>>, vector<1x32xf32>
    %68 = vector.broadcast %67 : vector<1x32xf32> to vector<8x32xf32>
    %69 = arith.addf %66, %68 : vector<8x32xf32>
    %70 = arith.addf %69, %1 : vector<8x32xf32>
    %71 = arith.truncf %70 : vector<8x32xf32> to vector<8x32xbf16>
    %c0_26 = arith.constant 0 : index
    %c0_27 = arith.constant 0 : index
    %72 = vector.load %arg8[%c0_26, %c0_27] : memref<32x32xbf16, #tpu.memory_space<vmem>>, vector<32x32xbf16>
    %cst_28 = arith.constant dense<0.000000e+00> : vector<8x32xf32>
    %73 = tpu.matmul %71, %72, %cst_28 {dimension_numbers = #tpu.dot_dimension_numbers<[1], [0], [0], [1], [0, 0, 1, 1], [], []>} : vector<8x32xbf16>, vector<32x32xbf16>, vector<8x32xf32> -> vector<8x32xf32>
    %74 = arith.truncf %73 : vector<8x32xf32> to vector<8x32xbf16>
    %c0_29 = arith.constant 0 : index
    %c0_30 = arith.constant 0 : index
    %75 = vector.load %arg9[%c0_29, %c0_30] : memref<32x32xbf16, #tpu.memory_space<vmem>>, vector<32x32xbf16>
    %cst_31 = arith.constant dense<0.000000e+00> : vector<8x32xf32>
    %76 = tpu.matmul %74, %75, %cst_31 {dimension_numbers = #tpu.dot_dimension_numbers<[1], [0], [0], [1], [0, 0, 1, 1], [], []>} : vector<8x32xbf16>, vector<32x32xbf16>, vector<8x32xf32> -> vector<8x32xf32>
    %77 = arith.addf %70, %76 : vector<8x32xf32>
    %c0_32 = arith.constant 0 : index
    %c0_33 = arith.constant 0 : index
    %c0_34 = arith.constant 0 : index
    %78 = vector.load %arg10[%c0_32, %c0_33, %c0_34] : memref<1x8x32xf32, #tpu.memory_space<vmem>>, vector<1x8x32xf32>
    %79 = vector.shape_cast %78 : vector<1x8x32xf32> to vector<8x32xf32>
    %80 = vector.shape_cast %77 : vector<8x32xf32> to vector<1x8x32xf32>
    tpu.vector_store %arg10[%c0_32, %c0_33, %c0_34], %80 {strides = array<i32>} : memref<1x8x32xf32, #tpu.memory_space<vmem>>, vector<1x8x32xf32>,
    return
  }
  func.func @transform_0(%arg0: i32) -> (i32, i32, i32) {
    %c0_i32 = arith.constant 0 : i32
    %c0_i32_0 = arith.constant 0 : i32
    %c0_i32_1 = arith.constant 0 : i32
    return %arg0, %c0_i32, %c0_i32_0 : i32, i32, i32
  }
  func.func @transform_1(%arg0: i32) -> (i32, i32) {
    %c0_i32 = arith.constant 0 : i32
    %c0_i32_0 = arith.constant 0 : i32
    %c0_i32_1 = arith.constant 0 : i32
    return %c0_i32, %c0_i32_0 : i32, i32
  }
  func.func @transform_2(%arg0: i32) -> (i32, i32) {
    %c0_i32 = arith.constant 0 : i32
    %c0_i32_0 = arith.constant 0 : i32
    %c0_i32_1 = arith.constant 0 : i32
    return %c0_i32, %c0_i32_0 : i32, i32
  }
  func.func @transform_3(%arg0: i32) -> (i32, i32) {
    %c0_i32 = arith.constant 0 : i32
    %c0_i32_0 = arith.constant 0 : i32
    %c0_i32_1 = arith.constant 0 : i32
    return %c0_i32, %c0_i32_0 : i32, i32
  }
  func.func @transform_4(%arg0: i32) -> (i32, i32) {
    %c0_i32 = arith.constant 0 : i32
    %c0_i32_0 = arith.constant 0 : i32
    %c0_i32_1 = arith.constant 0 : i32
    return %c0_i32, %c0_i32_0 : i32, i32
  }
  func.func @transform_5(%arg0: i32) -> (i32, i32, i32) {
    %c0_i32 = arith.constant 0 : i32
    %c0_i32_0 = arith.constant 0 : i32
    %c0_i32_1 = arith.constant 0 : i32
    %c0_i32_2 = arith.constant 0 : i32
    return %c0_i32, %c0_i32_0, %c0_i32_1 : i32, i32, i32
  }
  func.func @transform_6(%arg0: i32) -> (i32, i32) {
    %c0_i32 = arith.constant 0 : i32
    %c0_i32_0 = arith.constant 0 : i32
    %c0_i32_1 = arith.constant 0 : i32
    return %c0_i32, %c0_i32_0 : i32, i32
  }
  func.func @transform_7(%arg0: i32) -> (i32, i32) {
    %c0_i32 = arith.constant 0 : i32
    %c0_i32_0 = arith.constant 0 : i32
    %c0_i32_1 = arith.constant 0 : i32
    return %c0_i32, %c0_i32_0 : i32, i32
  }
  func.func @transform_8(%arg0: i32) -> (i32, i32) {
    %c0_i32 = arith.constant 0 : i32
    %c0_i32_0 = arith.constant 0 : i32
    %c0_i32_1 = arith.constant 0 : i32
    return %c0_i32, %c0_i32_0 : i32, i32
  }
  func.func @transform_9(%arg0: i32) -> (i32, i32, i32) {
    %c0_i32 = arith.constant 0 : i32
    %c0_i32_0 = arith.constant 0 : i32
    %c0_i32_1 = arith.constant 0 : i32
    return %arg0, %c0_i32, %c0_i32_0 : i32, i32, i32
  }
}

</mosaic_0001>

<bundles_post_ra>
// kernel: tpu_custom_call.1
= control target key start
LH: loop header
LB: loop body
LE: loop exit
PB: predicated region body
PF: predicated region fallthrough
CT: control target
= control target key end

     0   :  { %s2013_s0 = inlined_call_operand.hbm [shape: f32[2,8,32], index: 0, kind: input, shape index: {}]   ;;  %s2014_s1 = inlined_call_operand.hbm [shape: bf16[32,32], index: 1, kind: input, shape index: {}]   ;;  %s2015_s2 = inlined_call_operand.hbm [shape: bf16[32,32], index: 2, kind: input, shape index: {}]   ;;  %s2016_s3 = inlined_call_operand.hbm [shape: bf16[32,32], index: 3, kind: input, shape index: {}]   ;;  %s2017_s4 = inlined_call_operand.hbm [shape: f32[3,32], index: 4, kind: input, shape index: {}]   ;;  %s2018_s5 = inlined_call_operand.hbm [shape: bf16[4,8,32], index: 5, kind: input, shape index: {}]   ;;  %s2019_s6 = inlined_call_operand.vmem [shape: f32[1,32], index: 6, kind: input, shape index: {}]   ;;  %s2020_s7 = inlined_call_operand.hbm [shape: bf16[32,32], index: 7, kind: input, shape index: {}]   ;;  %s2021_s8 = inlined_call_operand.hbm [shape: bf16[32,32], index: 8, kind: input, shape index: {}]   ;;  %s2022_s9 = inlined_call_operand.hbm [shape: f32[2,8,32], index: 9, kind: output, shape index: {}]  }
   0x1   :  { %2023 = sst [smem:[#allocation23_spill]] %s2014_s1 }
   0x2   :  { %2024 = sst [smem:[#allocation24_spill]] %s2015_s2 }
   0x3   :  { %2025 = sst [smem:[#allocation25_spill]] %s2016_s3 }
   0x4   :  { %14 = vsyncpa [#allocation3], 0 }
   0x5   :  { %16 = vsyncpa [#allocation3 + $0x1], 0 }
   0x6   :  { %17 = vsyncpa [#allocation6], 0 }
   0x7   :  { %18 = vsyncpa [#allocation9], 0 }
   0x8   :  { %19 = vsyncpa [#allocation12], 0 }
   0x9   :  { %20 = vsyncpa [#allocation15], 0 }
   0xa   :  { %21 = vsyncpa [#allocation4], 0 }
   0xb   :  { %23 = vsyncpa [#allocation4 + $0x1], 0  ;;  %s1748_s30 = smov 0   ;;  %s1750_s10 = smov 0  }
   0xc   :  { %s1752_s11 = smov 0   ;;  %s1754_s12 = smov 0  }
   0xd LB: > { %s2026_s1 = sld [smem:[#allocation23_spill]]  ;;  %s1772_s16 = sadd.s32 4294967295, %s1684_s12   ;;  %s1684_s12 = sphi %s1754_s12, %s2039_s12   ;;  %s1680_s11 = sphi %s1752_s11, %s2038_s11   ;;  %s1676_s10 = sphi %s1750_s10, %s2037_s10   ;;  %s1672_s30 = sphi %s1748_s30, %s2036_s30  }
   0xe   : > { %p1128_p0 = scmp.ge.s32.totalorder %s1684_s12, 1  ;;  %p50_p1 = scmp.eq.s32.totalorder %s1772_s16, 0 }
   0xf   : > { %p254_p2 = scmp.lt.s32.totalorder %s1684_s12, 3  ;;  %s1686_s18 = smov [#allocation5]  }
  0x10   : > { %s267_s19 = sshll.u32 %s1686_s18, 4  ;;  %s2028_s3 = sld [smem:[#allocation25_spill]]  ;;  %s268_s19 = int_to_ptr.vmem [resolvable:$true] %s267_s19 }
  0x11   : > { %p1777_p3 = pnand %p1128_p0, %p254_p2  ;;  %s319_s26 = sshll.u32 %s2018_s5, 4  ;;  %s320_s26 = int_to_ptr.hbm [resolvable:$true] %s319_s26 }
  0x12   : > { %s1687_s27 = smov [#allocation8]   ;;  %s1688_s29 = smov 64  }
  0x13   : > { %s265_s15 = sshll.u32 %s2026_s1, 4  ;;  %p1252_p4 = pneg %p1777_p3  ;;  %s266_s15 = int_to_ptr.hbm [resolvable:$true] %s265_s15 }
  0x14   : > { %s295_s28 = sshll.u32 %s1687_s27, 4  ;;  %s1689_s13 = smov 4   ;;  %s296_s28 = int_to_ptr.vmem [resolvable:$true] %s295_s28 }
  0x15   : > { %p1789_p6 = pnand %p1252_p4, %p50_p1  ;;  %s2030_s2 = sld [smem:[#allocation24_spill]] }
  0x16   : > { %s293_s22 = sshll.u32 %s2028_s3, 4  ;;  %s1690_s21 = smov [#allocation11]   ;;  %s294_s22 = int_to_ptr.hbm [resolvable:$true] %s293_s22 }
  0x17   : > { %1255 = dma.hbm_to_vmem [thread:$0]  (!%p1789_p6), %s266_s15, 256, %s268_s19, [#allocation6], %s1688_s29, %s1688_s29, %s1689_s13  }
  0x18   : > { %1261 = dma.hbm_to_vmem [thread:$0]  (!%p1789_p6), %s294_s22, 256, %s296_s28, [#allocation9], %s1688_s29, %s1688_s29, %s1689_s13  }
  0x19   : > { %s321_s24 = sshll.u32 %s1690_s21, 4  ;;  %s1691_s15 = smov [#allocation7]   ;;  %s322_s24 = int_to_ptr.vmem [resolvable:$true] %s321_s24 }
  0x1a   : > { %1267 = dma.hbm_to_vmem [thread:$0]  (!%p1789_p6), %s320_s26, 256, %s322_s24, [#allocation12], %s1688_s29, %s1688_s29, %s1689_s13  }
  0x1b   : > { %s279_s20 = sshll.u32 %s2030_s2, 4  ;;  %s281_s19 = sshll.u32 %s1691_s15, 4  ;;  %s280_s20 = int_to_ptr.hbm [resolvable:$true] %s279_s20  ;;  %s282_s19 = int_to_ptr.vmem [resolvable:$true] %s281_s19 }
  0x1c   : > { %s308_s22 = sshll.u32 %s2017_s4, 4  ;;  %s336_s18 = sshll.u32 %s2020_s7, 4  ;;  %s309_s22 = int_to_ptr.hbm [resolvable:$true] %s308_s22  ;;  %s337_s18 = int_to_ptr.hbm [resolvable:$true] %s336_s18 }
  0x1d   : > { %1258 = dma.hbm_to_vmem [thread:$0]  (!%p1789_p6), %s280_s20, 256, %s282_s19, [#allocation6], %s1688_s29, %s1688_s29, %s1689_s13  }
  0x1e   : > { %s1692_s26 = smov [#allocation10]   ;;  %s1693_s24 = smov [#allocation13]  }
  0x1f   : > { %s310_s21 = sshll.u32 %s1692_s26, 4  ;;  %s338_s20 = sshll.u32 %s1693_s24, 4  ;;  %s311_s21 = int_to_ptr.vmem [resolvable:$true] %s310_s21  ;;  %s339_s20 = int_to_ptr.vmem [resolvable:$true] %s338_s20 }
  0x20   : > { %1264 = dma.hbm_to_vmem [thread:$0]  (!%p1789_p6), %s309_s22, 64, %s311_s21, [#allocation9]  }
  0x21   : > { %s350_s25 = sshll.u32 %s2021_s8, 4  ;;  %s1694_s27 = smov [#allocation14]   ;;  %s351_s25 = int_to_ptr.hbm [resolvable:$true] %s350_s25 }
  0x22   : > { %1270 = dma.hbm_to_vmem [thread:$0]  (!%p1789_p6), %s337_s18, 256, %s339_s20, [#allocation12], %s1688_s29, %s1688_s29, %s1689_s13  }
  0x23   : > { %s352_s22 = sshll.u32 %s1694_s27, 4  ;;  %s1127_s28 = sadd.s32 4294967294, %s1684_s12   ;;  %s353_s22 = int_to_ptr.vmem [resolvable:$true] %s352_s22 }
  0x24   : > { %1273 = dma.hbm_to_vmem [thread:$0]  (!%p1789_p6), %s351_s25, 256, %s353_s22, [#allocation15], %s1688_s29, %s1688_s29, %s1689_s13  }
  0x25   : > { %s1842_s14 = sadd.s32 1, %s1684_s12   ;;  %s36_s26 = sadd.s32 1, %s1680_s11 }
  0x26   : > { %s33_s21 = ssub.s32 %s1684_s12, %s1842_s14  ;;  %p43_p7 = scmp.ne.s32.totalorder %s1680_s11, %s1676_s10 }
  0x27   : > { %p34_p8 = scmp.eq.s32.totalorder %s33_s21, 0  ;;  %p44_p9 = scmp.eq.s32.totalorder %s1684_s12, 0 }
  0x28   : > { %p49_p10 = scmp.ne.s32.totalorder %s1676_s10, %s1672_s30  ;;  %p241_p11 = scmp.eq.s32.totalorder %s1772_s16, 1 }
  0x29   : > { %s1854_s18 = scalar_select %p34_p8, %s1680_s11, %s36_s26  }
  0x2a   : > { %p1858_p12 = por %p50_p1, %p49_p10  ;;  %p1862_p13 = por %p241_p11, %p43_p7 }
  0x2b   : > { %p247_p0 = scmp.eq.s32.totalorder %s1127_s28, 1  ;;  %p45_p2 = por %p44_p9, %p43_p7 }
  0x2c   : > { %s366_s13 = sand.u32 1, %s1680_s11   ;;  %p1289_p6 = scmp.lt.s32.totalorder %s1684_s12, 2 }
  0x2d   : > { %p1867_p4 = por %p247_p0, %p49_p10  ;;  %s1137_s20 = sshll.u32 %s366_s13, 3 }
  0x2e   : > { %s1138_s15 = sshll.u32 %s1684_s12, 3  ;;  %s370_s26 = scalar_lea.vmem [#allocation2], %s1137_s20 }
  0x2f   : > { %s374_s27 = scalar_lea.hbm %s2013_s0, %s1138_s15  ;;  %s378_s21 = sshll.u32 %s370_s26, 4  ;;  %s379_s21 = int_to_ptr.vmem [resolvable:$true] %s378_s21 }
  0x30   : > { %s376_s22 = sshll.u32 %s374_s27, 4  ;;  %p1876_p8 = pnand %p1289_p6, %p45_p2  ;;  %s377_s22 = int_to_ptr.hbm [resolvable:$true] %s376_s22 }
  0x31   : > { %s367_s1 = scalar_lea.sflag [#allocation3], %s366_s13  ;;  %s1572_s2 = sshra.s32 %s377_s22, 4  ;;  %s1573_s2 = int_to_ptr.hbm [resolvable:$true] %s1572_s2 }
  0x32   : > { %s1574_s3 = scalar_lea.hbm %s1573_s2, 8  ;;  %p1576_p9 = pneg %p1876_p8 }
  0x33   : > { %p1575_p7 = scmp.ne.s32.totalorder %s1573_s2, %s1574_s3  ;;  %s1579_s20 = scalar_lea.hbm %s2013_s0, 16 }
  0x34   : > { %p1580_p0 = scmp.lt.s32.totalorder %s1573_s2, %s2013_s0  ;;  %p1581_p2 = scmp.lt.s32.totalorder %s1579_s20, %s1574_s3 }
  0x35   : > { %p1577_p10 = pnand %p1576_p9, %p1575_p7 }
  0x36   : > { %p1582_p6 = por %p1581_p2, %p1580_p0 }
  0x37   : > { %p1578_p11 = pneg %p1577_p10 }
  0x39   : > { %p1583_p5 = pnand %p1582_p6, %p1578_p11 }
  0x3b   : > { %1586 = shalt.err (!%p1583_p5)
}
  0x3c   : > { %1277 = dma.hbm_to_vmem [thread:$0]  (!%p1876_p8), %s377_s22, 128, %s379_s21, %s367_s1  }
  0x3d   : > { %387 = sbr.rel (%p1777_p3) target bundleno = 1286 (0x506), region = 56  ;;  %s1893_s13 = sand.u32 (!%p1777_p3), 1, %s1676_s10  }
  0x3e   : > { %s1140_s26 = sshll.u32 (!%p1777_p3), %s1893_s13, 3  ;;  %s390_s15 = scalar_lea.sflag (!%p1777_p3), [#allocation3], %s1893_s13 }
  0x3f   : > { %s393_s2 = scalar_lea.vmem (!%p1777_p3), [#allocation2], %s1140_s26 }
  0x42   : > { %1647 = dma.done.wait (%p1858_p12), %s390_s15, 128  }
  0x43   : > { %1649 = vsyncadd (%p1858_p12), %s390_s15, 4294967168 }
  0x44   : > { %1651 = dma.done.wait (%p50_p1), [#allocation6], 512  }
  0x45   : > { %1653 = vsyncadd (%p50_p1), [#allocation6], 4294966784 }
  0x46   : > { %1655 = dma.done.wait (%p50_p1), [#allocation9], 320  }
  0x47   : > { %1657 = vsyncadd (%p50_p1), [#allocation9], 4294966976 }
  0x48   : > { %1659 = dma.done.wait (%p50_p1), [#allocation12], 512  }
  0x49   : > { %1661 = vsyncadd (%p50_p1), [#allocation12], 4294966784 }
  0x4a   : > { %1663 = dma.done.wait (%p50_p1), [#allocation15], 256  }
  0x4b   : > { %1665 = vsyncadd (%p50_p1), [#allocation15], 4294967040  ;;  %v1213_v0 = vld [vmem:[#allocation7 + $0x8] sm:$0xff]  ;;  %v1211_v1 = vld [vmem:[#allocation5 + $0x8] sm:$0xff]  ;;  %vm485_vm0 = vcmask 261120   ;;  %vm607_vm1 = vcmask 64512  }
  0x4c   : > { %v1212_v2 = vld [vmem:[#allocation7] sm:$0xff]  ;;  %526 = vmatpush.bf16.msra.mxu1 %v1213_v0  ;;  %495 = vmatpush.bf16.msra.mxu0 %v1211_v1  ;;  %v1210_v4 = vld [vmem:[#allocation5] sm:$0xff]  ;;  %s1695_s1 = smov 120   ;;  %s1696_s3 = smov 104   ;;  %v1215_v18 = vld [vmem:[#allocation8 + $0x8] sm:$0xff]  ;;  %vm735_vm2 = vcmask 1043456  }
  0x4d   : > { %v1919_v3 = vld [vmem:[%s393_s2] sm:$0xff]  ;;  %s1697_s17 = smov 112   ;;  %557 = vmatpush.bf16.msra.mxu2 %v1215_v18  ;;  %v1214_v19 = vld [vmem:[#allocation8] sm:$0xff]  ;;  %s1207_s21 = sshll.u32 %s1772_s16, 3 }
  0x4e   : > { %v466_v5 = vpack.c.bf16 %v1919_v3, %v1919_v3  ;;  %v1342_v6 = vld [vmem:[#allocation10 + $0x1] ss:$0 sm:$0xff]  ;;  %v1343_v7 = vld [vmem:[#allocation10] ss:$0 sm:$0xff]  ;;  %v1344_v40 = vld [vmem:[#allocation10 + $0x2] ss:$0 sm:$0xff]  ;;  %s985_s20 = scalar_lea.hbm %s2022_s9, %s1207_s21 }
  0x4f   : > { %s463_s25 = scalar_lea.vmem [#allocation16], %s1140_s26  ;;  %s989_s15 = sshll.u32 %s985_s20, 4  ;;  %s990_s15 = int_to_ptr.hbm [resolvable:$true] %s989_s15 }
  0x50   : > { %527 = vmatpush.bf16.msra.mxu1 %v1212_v2  ;;  %496 = vmatpush.bf16.msra.mxu0 %v1210_v4  ;;  %s987_s27 = sshll.u32 %s463_s25, 4  ;;  %s975_s2 = scalar_lea.sflag [#allocation4], %s1893_s13  ;;  %s988_s27 = int_to_ptr.vmem [resolvable:$true] %s987_s27 }
  0x51   : > { %558 = vmatpush.bf16.msra.mxu2 %v1214_v19  ;;  %s1622_s26 = scalar_lea.hbm %s2022_s9, 16 }
  0x53   : > { %1166 = vmatmul.msk.bf16.vlgmr.msra.gmra.mxu1 %vm485_vm0, %v466_v5  ;;  %1157 = vmatmul.msk.bf16.vlgmr.msra.gmra.mxu0 %vm485_vm0, %v466_v5 }
  0x54   : > { %1175 = vmatmul.msk.bf16.vlgmr.msra.gmra.mxu2 %vm485_vm0, %v466_v5 }
  0xd0   : > { %v529_v8 = vpop.f32.mrf.mxu1  ;;  %v498_v9 = vpop.f32.mrf.mxu0 }
  0xd1   : > { %v530_v10 = vadd.f32 %v1342_v6, %v529_v8  ;;  %v499_v11 = vadd.f32 %v1343_v7, %v498_v9 }
  0xd3   : > { %580 = vrot.lane.b32.xlu1 %v530_v10, %s1695_s1  ;;  %586 = vrot.lane.b32.xlu0 %v530_v10, %s1696_s3  ;;  %v564_v12 = vmul.f32 0.35355338, %v499_v11  ;;  %v589_v13 = vpack.c.bf16 %v530_v10, %v530_v10 }
  0xd5   : > { %v612_v14 = vsel %vm607_vm1, %v589_v13, 0  ;;  %566 = vrot.lane.b32.xlu2 %v564_v12, %s1695_s1  ;;  %v575_v17 = vpack.c.bf16 %v564_v12, %v564_v12 }
  0xd6   : > { %621 = vmatpush.bf16.xpose.msra.mxu3 %v612_v14 }
  0xd7   : > { %v560_v38 = vpop.f32.mrf.mxu2 }
  0xd8   : > { %v531_v15 = vpop.f32.mrf.mxu1  ;;  %v500_v16 = vpop.f32.mrf.mxu0  ;;  %v561_v41 = vadd.f32 %v1344_v40, %v560_v38  ;;  %v814_v40 = vld [vmem:[#allocation11 + $0x4] sm:$0xf] }
  0xda   : > { %v603_v42 = vpack.c.bf16 %v561_v41, %v561_v41 }
  0xdb   : > { %583 = vrot.lane.b32.xlu1 %v530_v10, %s1697_s17  ;;  %572 = vrot.lane.b32.xlu0 %v564_v12, %s1696_s3 }
  0xdc   : > { %v737_v43 = vsel %vm735_vm2, %v603_v42, 0  ;;  %v816_v42 = vld [vmem:[#allocation11 + $0xc] sm:$0xf] }
  0xdd   : > { %1176 = vmatmul.msk.bf16.vlgmr.msra.gmra.mxu3 %vm607_vm1, %v575_v17  ;;  %569 = vrot.lane.b32.xlu2 %v564_v12, %s1697_s17  ;;  %v813_v17 = vld [vmem:[#allocation11] sm:$0xf] }
  0xde   : > { %746 = vmatpush.bf16.msrb.mxu3 %v737_v43  ;;  %v821_v18 = vsel %vm735_vm2, %v813_v17, 0  ;;  %v878_v43 = vsel %vm735_vm2, %v816_v42, 0 }
  0xdf   : > { %v562_v39 = vpop.f32.mrf.mxu2 }
  0xe2   : > { %830 = vmatpush.bf16.msra.mxu3 %v821_v18 }
 0x12f   : > { %v567_v26 = vpop.permute.xlu2 %566 }
 0x130   : > { %v576_v29 = vpack.c.bf16 %v567_v26, %v567_v26 }
 0x137   : > { %v570_v33 = vpop.permute.xlu2 %569 }
 0x138   : > { %v577_v34 = vpack.c.bf16 %v570_v33, %v570_v33 }
 0x145   : > { %v581_v20 = vpop.permute.xlu1 %580  ;;  %v587_v21 = vpop.permute.xlu0 %586 }
 0x146   : > { %v590_v22 = vpack.c.bf16 %v581_v20, %v581_v20  ;;  %v592_v23 = vpack.c.bf16 %v587_v21, %v587_v21 }
 0x148   : > { %v631_v24 = vsel %vm607_vm1, %v590_v22, 0  ;;  %v669_v25 = vsel %vm607_vm1, %v592_v23, 0 }
 0x149   : > { %640 = vmatpush.bf16.xpose.msrb.mxu0 %v631_v24  ;;  %678 = vmatpush.bf16.xpose.msrb.mxu2 %v669_v25 }
 0x14d   : > { %v584_v27 = vpop.permute.xlu1 %583  ;;  %v573_v28 = vpop.permute.xlu0 %572 }
 0x14e   : > { %v591_v30 = vpack.c.bf16 %v584_v27, %v584_v27  ;;  %v578_v31 = vpack.c.bf16 %v573_v28, %v573_v28 }
 0x150   : > { %1177 = vmatmul.msk.bf16.vlgmr.msrb.gmra.mxu0 %vm607_vm1, %v576_v29  ;;  %1179 = vmatmul.msk.bf16.vlgmr.msrb.gmra.mxu2 %vm607_vm1, %v578_v31  ;;  %v650_v32 = vsel %vm607_vm1, %v591_v30, 0 }
 0x151   : > { %659 = vmatpush.bf16.xpose.msrb.mxu1 %v650_v32 }
 0x158   : > { %1178 = vmatmul.msk.bf16.vlgmr.msrb.gmra.mxu1 %vm607_vm1, %v577_v34 }
 0x160   : > { %v623_v35 = vpop.f32.mrf.mxu3 }
 0x161   : > { %v684_v36 = vsel %vm607_vm1, %v623_v35, -inf }
 0x162   : > { %685 = vmax.xlane.f32.xlu0 %v684_v36 }
 0x168   : > { %v625_v37 = vpop.f32.mrf.mxu3 }
 0x1cd   : > { %v642_v44 = vpop.f32.mrf.mxu0 }
 0x1ce   : > { %v687_v45 = vsel %vm607_vm1, %v642_v44, -inf }
 0x1cf   : > { %688 = vmax.xlane.f32.xlu2 %v687_v45 }
 0x1d3   : > { %v680_v46 = vpop.f32.mrf.mxu2 }
 0x1d4   : > { %v693_v47 = vsel %vm607_vm1, %v680_v46, -inf }
 0x1d5   : > { %v644_v48 = vpop.f32.mrf.mxu0  ;;  %v661_v49 = vpop.f32.mrf.mxu1  ;;  %694 = vmax.xlane.f32.xlu1 %v693_v47 }
 0x1d6   : > { %v686_v50 = vpop.xlane.xlu0 %685  ;;  %v690_v51 = vsel %vm607_vm1, %v661_v49, -inf }
 0x1d7   : > { %v696_v52 = vsub.f32 %v623_v35, %v686_v50  ;;  %691 = vmax.xlane.f32.xlu2 %v690_v51 }
 0x1d9   : > { %v700_v53 = vmul.f32 1.442695, %v696_v52 }
 0x1db   : > { %1346 = vpow2.f32 %v700_v53  ;;  %v682_v54 = vpop.f32.mrf.mxu2 }
 0x1dd   : > { %v663_v55 = vpop.f32.mrf.mxu1 }
 0x1e1   : > { %v1347_v56 = vpop.eup %1346 }
 0x1e2   : > { %v708_v57 = vsel %vm607_vm1, %v1347_v56, 0.0 }
 0x1e3   : > { %709 = vadd.xlane.f32.xlu0 %v708_v57  ;;  %v1217_v57 = vld [vmem:[#allocation13 + $0x8] sm:$0xff] }
 0x1ef   : > { %600 = vrot.lane.b32.xlu2 %v561_v41, %s1696_s3 }
 0x242   : > { %v689_v58 = vpop.xlane.xlu2 %688 }
 0x243   : > { %v697_v59 = vsub.f32 %v642_v44, %v689_v58  ;;  %v815_v44 = vld [vmem:[#allocation11 + $0x8] sm:$0xf]  ;;  %v1216_v58 = vld [vmem:[#allocation13] sm:$0xff] }
 0x244   : > { %v859_v45 = vsel %vm735_vm2, %v815_v44, 0 }
 0x245   : > { %v702_v60 = vmul.f32 1.442695, %v697_v59 }
 0x247   : > { %1348 = vpow2.f32 %v702_v60  ;;  %v1219_v60 = vld [vmem:[#allocation14 + $0x8] sm:$0xff] }
 0x248   : > { %v695_v61 = vpop.xlane.xlu1 %694 }
 0x249   : > { %v699_v1 = vsub.f32 %v680_v46, %v695_v61 }
 0x24a   : > { %v692_v62 = vpop.xlane.xlu2 %691 }
 0x24b   : > { %v698_v63 = vsub.f32 %v661_v49, %v692_v62  ;;  %v706_v5 = vmul.f32 1.442695, %v699_v1 }
 0x24d   : > { %v1349_v0 = vpop.eup %1348  ;;  %v704_v2 = vmul.f32 1.442695, %v698_v63 }
 0x24e   : > { %v711_v4 = vsel %vm607_vm1, %v1349_v0, 0.0 }
 0x24f   : > { %1350 = vpow2.f32 %v704_v2  ;;  %712 = vadd.xlane.f32.xlu0 %v711_v4 }
 0x250   : > { %1352 = vpow2.f32 %v706_v5 }
 0x252   : > { %v601_v6 = vpop.permute.xlu2 %600 }
 0x253   : > { %v606_v7 = vpack.c.bf16 %v601_v6, %v601_v6 }
 0x255   : > { %v1351_v8 = vpop.eup %1350  ;;  %v794_v9 = vsel %vm735_vm2, %v606_v7, 0  ;;  %v1345_v7 = vld [vmem:[%s2019_s6] ss:$0 sm:$0xff] }
 0x256   : > { %v710_v10 = vpop.xlane.xlu0 %709  ;;  %803 = vmatpush.bf16.msra.mxu2 %v794_v9  ;;  %v714_v11 = vsel %vm607_vm1, %v1351_v8, 0.0  ;;  %v1353_v12 = vpop.eup %1352 }
 0x257   : > { %1354 = vrcp.f32 %v710_v10  ;;  %715 = vadd.xlane.f32.xlu1 %v714_v11  ;;  %v717_v15 = vsel %vm607_vm1, %v1353_v12, 0.0 }
 0x25a   : > { %887 = vmatpush.bf16.msrb.mxu2 %v878_v43 }
 0x25d   : > { %v1355_v13 = vpop.eup %1354 }
 0x25e   : > { %v724_v14 = vmul.f32 %v1355_v13, %v1347_v56 }
 0x25f   : > { %718 = vadd.xlane.f32.xlu1 %v717_v15 }
 0x260   : > { %v728_v16 = vpack.c.bf16 %v724_v14, %v724_v14  ;;  %v1218_v14 = vld [vmem:[#allocation14] sm:$0xff] }
 0x262   : > { %1180 = vmatmul.msk.bf16.vlgmr.msrb.gmra.mxu3 %vm607_vm1, %v728_v16 }
 0x263   : > { %594 = vrot.lane.b32.xlu0 %v561_v41, %s1695_s1  ;;  %932 = vmatpush.bf16.msrb.mxu3 %v1217_v57  ;;  %s1616_s1 = sshra.s32 %s990_s15, 4  ;;  %s1617_s1 = int_to_ptr.hbm [resolvable:$true] %s1616_s1 }
 0x264   : > { %s1618_s3 = scalar_lea.hbm %s1617_s1, 8  ;;  %p1623_p12 = scmp.lt.s32.totalorder %s1617_s1, %s2022_s9 }
 0x265   : > { %p1619_p1 = scmp.ne.s32.totalorder %s1617_s1, %s1618_s3  ;;  %p1624_p8 = scmp.lt.s32.totalorder %s1622_s26, %s1618_s3 }
 0x267   : > { %933 = vmatpush.bf16.msrb.mxu3 %v1216_v58  ;;  %p1620_p3 = pnand %p1619_p1, %p1862_p13  ;;  %p1625_p7 = por %p1624_p8, %p1623_p12 }
 0x269   : > { %p1621_p5 = pneg %p1620_p3 }
 0x26b   : > { %p1626_p9 = pnand %p1625_p7, %p1621_p5 }
 0x278   : > { %597 = vrot.lane.b32.xlu1 %v561_v41, %s1697_s17  ;;  %v840_v41 = vsel %vm735_vm2, %v814_v40, 0 }
 0x2c2   : > { %v713_v19 = vpop.xlane.xlu0 %712 }
 0x2c3   : > { %1356 = vrcp.f32 %v713_v19 }
 0x2c9   : > { %v1357_v22 = vpop.eup %1356 }
 0x2ca   : > { %v716_v20 = vpop.xlane.xlu1 %715  ;;  %v725_v24 = vmul.f32 %v1357_v22, %v1349_v0 }
 0x2cc   : > { %v729_v28 = vpack.c.bf16 %v725_v24, %v725_v24 }
 0x2d2   : > { %v719_v21 = vpop.xlane.xlu1 %718 }
 0x2d3   : > { %1358 = vrcp.f32 %v719_v21 }
 0x2d4   : > { %1360 = vrcp.f32 %v716_v20 }
 0x2d5   : > { %v595_v23 = vpop.permute.xlu0 %594 }
 0x2d6   : > { %v604_v25 = vpack.c.bf16 %v595_v23, %v595_v23 }
 0x2d8   : > { %v756_v26 = vsel %vm735_vm2, %v604_v25, 0 }
 0x2d9   : > { %v1359_v27 = vpop.eup %1358  ;;  %765 = vmatpush.bf16.msra.mxu0 %v756_v26 }
 0x2da   : > { %v727_v29 = vmul.f32 %v1359_v27, %v1353_v12  ;;  %v1361_v33 = vpop.eup %1360 }
 0x2db   : > { %v726_v35 = vmul.f32 %v1361_v33, %v1351_v8 }
 0x2dc   : > { %v731_v30 = vpack.c.bf16 %v727_v29, %v727_v29  ;;  %1181 = vmatmul.msk.bf16.vlgmr.msra.gmra.mxu0 %vm607_vm1, %v729_v28 }
 0x2dd   : > { %v730_v39 = vpack.c.bf16 %v726_v35, %v726_v35  ;;  %849 = vmatpush.bf16.msrb.mxu0 %v840_v41 }
 0x2de   : > { %1183 = vmatmul.msk.bf16.vlgmr.msra.gmra.mxu2 %vm607_vm1, %v731_v30 }
 0x2e1   : > { %965 = vmatpush.bf16.msra.mxu0 %v1219_v60 }
 0x2e5   : > { %v748_v31 = vpop.f32.mrf.mxu3  ;;  %966 = vmatpush.bf16.msra.mxu0 %v1218_v14 }
 0x2e6   : > { %v809_v32 = vpack.c.bf16 %v748_v31, %v748_v31 }
 0x2e8   : > { %1184 = vmatmul.msk.bf16.vlgmr.msra.gmra.mxu3 %vm607_vm1, %v809_v32 }
 0x2ea   : > { %v598_v34 = vpop.permute.xlu1 %597 }
 0x2eb   : > { %v605_v36 = vpack.c.bf16 %v598_v34, %v598_v34 }
 0x2ed   : > { %v775_v37 = vsel %vm735_vm2, %v605_v36, 0  ;;  %v750_v38 = vpop.f32.mrf.mxu3 }
 0x2ee   : > { %784 = vmatpush.bf16.msra.mxu1 %v775_v37 }
 0x2f1   : > { %1182 = vmatmul.msk.bf16.vlgmr.msra.gmra.mxu1 %vm607_vm1, %v730_v39 }
 0x2f2   : > { %868 = vmatpush.bf16.msrb.mxu1 %v859_v45 }
 0x359   : > { %v767_v46 = vpop.f32.mrf.mxu0 }
 0x35a   : > { %v810_v47 = vpack.c.bf16 %v767_v46, %v767_v46 }
 0x35c   : > { %1185 = vmatmul.msk.bf16.vlgmr.msrb.gmra.mxu0 %vm607_vm1, %v810_v47 }
 0x361   : > { %v769_v48 = vpop.f32.mrf.mxu0  ;;  %v805_v49 = vpop.f32.mrf.mxu2 }
 0x362   : > { %v812_v50 = vpack.c.bf16 %v805_v49, %v805_v49 }
 0x364   : > { %1187 = vmatmul.msk.bf16.vlgmr.msrb.gmra.mxu2 %vm607_vm1, %v812_v50 }
 0x369   : > { %v807_v51 = vpop.f32.mrf.mxu2 }
 0x36b   : > { %v832_v52 = vpop.f32.mrf.mxu3 }
 0x36c   : > { %v893_v0 = vsel %vm485_vm0, %v832_v52, 0.0 }
 0x36e   : > { %v786_v53 = vpop.f32.mrf.mxu1 }
 0x36f   : > { %v811_v54 = vpack.c.bf16 %v786_v53, %v786_v53 }
 0x371   : > { %1186 = vmatmul.msk.bf16.vlgmr.msrb.gmra.mxu1 %vm607_vm1, %v811_v54 }
 0x373   : > { %v834_v55 = vpop.f32.mrf.mxu3 }
 0x376   : > { %v788_v56 = vpop.f32.mrf.mxu1 }
 0x3d9   : > { %v851_v59 = vpop.f32.mrf.mxu0 }
 0x3da   : > { %v894_v63 = vsel %vm485_vm0, %v851_v59, 0.0 }
 0x3db   : > { %v895_v1 = vadd.f32 %v894_v63, %v893_v0 }
 0x3e1   : > { %v853_v61 = vpop.f32.mrf.mxu0 }
 0x3e7   : > { %v889_v62 = vpop.f32.mrf.mxu2 }
 0x3e8   : > { %v898_v8 = vsel %vm485_vm0, %v889_v62, 0.0 }
 0x3ee   : > { %v870_v2 = vpop.f32.mrf.mxu1 }
 0x3ef   : > { %v896_v4 = vsel %vm485_vm0, %v870_v2, 0.0  ;;  %v891_v5 = vpop.f32.mrf.mxu2 }
 0x3f0   : > { %v897_v6 = vadd.f32 %v896_v4, %v895_v1 }
 0x3f2   : > { %v899_v9 = vadd.f32 %v898_v8, %v897_v6 }
 0x3f4   : > { %v904_v10 = vadd.f32 %v1345_v7, %v899_v9 }
 0x3f6   : > { %v905_v11 = vadd.f32 %v904_v10, %v1919_v3  ;;  %v872_v12 = vpop.f32.mrf.mxu1 }
 0x3f8   : > { %v906_v13 = vpack.c.bf16 %v905_v11, %v905_v11 }
 0x3fa   : > { %1196 = vmatmul.msk.bf16.vlgmr.msrb.gmra.mxu3 %vm485_vm0, %v906_v13 }
 0x47d   : > { %v935_v15 = vpop.f32.mrf.mxu3 }
 0x47e   : > { %v939_v16 = vpack.c.bf16 %v935_v15, %v935_v15 }
 0x480   : > { %1205 = vmatmul.msk.bf16.vlgmr.msra.gmra.mxu0 %vm485_vm0, %v939_v16 }
 0x485   : > { %v937_v17 = vpop.f32.mrf.mxu3 }
 0x4fd   : > { %v968_v3 = vpop.f32.mrf.mxu0 }
 0x4fe   : > { %v972_v18 = vadd.f32 %v968_v3, %v905_v11 }
 0x500   : > { %973 = vst.msk [vmem:[%s463_s25] sm:$0xff] %vm485_vm0, %v972_v18 }
 0x501   : > { %1629 = shalt.err (!%p1626_p9)
}
 0x502   : > { %1250 = dma.vmem_to_hbm [thread:$0]  (%p1862_p13), %s988_s27, 128, %s990_s15, %s975_s2  }
 0x505   : > { %v970_v19 = vpop.f32.mrf.mxu0 }
 0x506 PF: > { %s1001_s13 = sand.u32 1, %s1672_s30   ;;  %p2035_p10 = scmp.ge.s32.totalorder %s1684_s12, 2 }
 0x507   : > { %s1002_s21 = scalar_lea.sflag [#allocation4], %s1001_s13 }
 0x508   : > { %p1279_p11 = pnand %p2035_p10, %p1867_p4 }
 0x50a   : > { %p1280_p0 = pneg %p1279_p11 }
 0x50c   : > { %1667 = dma.done.wait (%p1280_p0), %s1002_s21, 128  }
 0x50d   : > { %1669 = vsyncadd (%p1280_p0), %s1002_s21, 4294967168  ;;  %p26_p2 = scmp.ge.s32.totalorder %s1842_s14, 4   ;;  %s2036_s30 = smov %s1676_s10 }
 0x50e   : > { %s2037_s10 = smov %s1680_s11  ;;  %s2038_s11 = smov %s1854_s18 }
 0x50f   : > { %s2039_s12 = smov %s1842_s14  ;;  %28 = sbr.rel (!%p26_p2) target bundleno = 13 (0xd), region = 129 }
 0x514   :  { %1008 = vsyncpa [#allocation3], 1 }
 0x515   :  { %1010 = vsyncpa [#allocation3 + $0x1], 1 }
 0x516   :  { %1011 = vsyncpa [#allocation6], 1 }
 0x517   :  { %1012 = vsyncpa [#allocation9], 1 }
 0x518   :  { %1013 = vsyncpa [#allocation12], 1 }
 0x519   :  { %1014 = vsyncpa [#allocation15], 1 }
 0x51a   :  { %1015 = vsyncpa [#allocation4], 1 }
 0x51b   :  { %1017 = vsyncpa [#allocation4 + $0x1], 1 }

</bundles_post_ra>
